<compile_context>
chip_gen: v7x
topology: tpu7x:2x2x1
jax: 0.10.0
libtpu: 0.0.40
codegen_flags: <defaults>
</compile_context>

<pallas_src>
import jax
import jax.numpy as jnp
from jax.experimental import pallas as pl
from jax.experimental.pallas import tpu as pltpu

HIDDEN = 312   # rubert-tiny hidden size, fixed by nn.Linear(312, n_classes)
C_PAD = 128    # lane-dense padded class dim: kernel writes [B, 128], wrapper slices


def _pooler_fc_kernel(x_ref, wp_ref, bp_ref, wf_ref, bf_ref, o_ref):
    # x:  [B, H]      f32   (CLS hidden state)
    # wp: [H, H]      bf16  (pre-transposed pooler weight)
    # bp: [1, H]      f32
    # wf: [H, C_PAD]  bf16  (pre-transposed + lane-padded fc weight)
    # bf: [1, C_PAD]  f32
    # o:  [B, C_PAD]  f32
    x16 = x_ref[...].astype(jnp.bfloat16)                       # bf16 MXU operands
    pool = jnp.dot(x16, wp_ref[...],                            # f32 accumulation
                   preferred_element_type=jnp.float32)
    pool = jnp.tanh(pool + bp_ref[...])                         # BERT pooler (EUP tanh)
    acc = jnp.dot(pool.astype(jnp.bfloat16), wf_ref[...],
                  preferred_element_type=jnp.float32)
    o_ref[...] = (acc + bf_ref[...]).astype(o_ref.dtype)        # lane-dense store


def prepare_params(pooler_weight, pooler_bias, fc_weight, fc_bias):
    """One-time parameter prep (transpose / pad / bf16 cast).

    Called once at load time -- NOT in the per-call forward path, so no
    per-call transpose/reshape glue ops remain around the kernel.
    """
    H = HIDDEN
    C = fc_weight.shape[0]
    assert pooler_weight.shape == (H, H)
    assert fc_weight.shape == (C, H)
    assert C <= C_PAD

    wp_t = jnp.asarray(pooler_weight).T.astype(jnp.bfloat16)            # [H, H]
    bp = jnp.asarray(pooler_bias, jnp.float32).reshape(1, H)            # [1, H]
    wf_t = jnp.zeros((H, C_PAD), jnp.bfloat16).at[:, :C].set(
        jnp.asarray(fc_weight).T.astype(jnp.bfloat16))                  # [H, C_PAD]
    bf = jnp.zeros((1, C_PAD), jnp.float32).at[0, :C].set(
        jnp.asarray(fc_bias, jnp.float32))                              # [1, C_PAD]
    return wp_t, bp, wf_t, bf


def bert_cls_forward(cls_hidden, prepared, n_classes):
    """Fused pooler + fc:  tanh(cls_hidden @ Wp^T + bp) @ Wf^T + bf.

    cls_hidden: [B, 312] f32 -- CLS-token last hidden state from the external
                encoder (see TODO(synk) above).
    prepared:   output of prepare_params().
    returns:    [B, n_classes] f32 logits.
    """
    wp_t, bp, wf_t, bf = prepared
    B, H = cls_hidden.shape
    assert H == HIDDEN

    # Advisory cost hint so XLA does not serialize surrounding fusions around
    # this tiny custom call.
    cost = pl.CostEstimate(
        flops=2 * B * H * H + 2 * B * H * C_PAD,
        transcendentals=B * H,
        bytes_accessed=(B * H * 4 + H * H * 2 + H * 4
                        + H * C_PAD * 2 + C_PAD * 4 + B * C_PAD * 4))

    # Entire working set (~200 KiB) fits VMEM on every generation: single grid
    # step, full-extent blocks (no tiling / vmem_limit tuning needed).
    # NOTE: if the deployed batch grows (>=16), tile over B with
    # dimension_semantics=("parallel",) to use both v7x TensorCores.
    out_padded = pl.pallas_call(
        _pooler_fc_kernel,
        out_shape=jax.ShapeDtypeStruct((B, C_PAD), jnp.float32),
        grid_spec=pl.GridSpec(
            grid=(1,),
            in_specs=[
                pl.BlockSpec((B, H), lambda i: (0, 0)),
                pl.BlockSpec((H, H), lambda i: (0, 0)),
                pl.BlockSpec((1, H), lambda i: (0, 0)),
                pl.BlockSpec((H, C_PAD), lambda i: (0, 0)),
                pl.BlockSpec((1, C_PAD), lambda i: (0, 0)),
            ],
            out_specs=pl.BlockSpec((B, C_PAD), lambda i: (0, 0)),
        ),
        compiler_params=pltpu.CompilerParams(
            dimension_semantics=("arbitrary",)),
        cost_estimate=cost,
    )(cls_hidden, wp_t, bp, wf_t, bf)

    return out_padded[:, :n_classes]   # drop lane padding


if __name__ == "__main__":
    key = jax.random.PRNGKey(0)
    k_x, k_pw, k_pb, k_fw, k_fb = jax.random.split(key, 5)

    B = 2          # batch (pad to a multiple of 8 in production if controllable)
    n_classes = 4  # small class count

    # TODO(synk): stand-in for the external encoder's CLS-token last hidden state.
    cls_hidden = jax.random.normal(k_x, (B, HIDDEN), dtype=jnp.float32)

    bound = 1.0 / (HIDDEN ** 0.5)
    pooler_weight = jax.random.uniform(
        k_pw, (HIDDEN, HIDDEN), minval=-bound, maxval=bound, dtype=jnp.float32)
    pooler_bias = jax.random.uniform(
        k_pb, (HIDDEN,), minval=-bound, maxval=bound, dtype=jnp.float32)
    fc_weight = jax.random.uniform(
        k_fw, (n_classes, HIDDEN), minval=-bound, maxval=bound, dtype=jnp.float32)
    fc_bias = jax.random.uniform(
        k_fb, (n_classes,), minval=-bound, maxval=bound, dtype=jnp.float32)

    # One-time param prep (transpose / pad / bf16), outside the per-call path.
    prepared = prepare_params(pooler_weight, pooler_bias, fc_weight, fc_bias)

    logits = bert_cls_forward(cls_hidden, prepared, n_classes)
    logits = jax.block_until_ready(logits)

    # Reference (full f32, PyTorch semantics): fc(tanh(cls @ Wp.T + bp))
    pooler_ref = jnp.tanh(cls_hidden @ pooler_weight.T + pooler_bias)
    ref = pooler_ref @ fc_weight.T + fc_bias

    assert logits.shape == (B, n_classes)
    assert jnp.allclose(logits, ref, atol=5e-2, rtol=5e-2), (
        float(jnp.max(jnp.abs(logits - ref))))

    print("KERNEL_OK")
</pallas_src>

<mosaic_0001>
module attributes {stable_mosaic.version = 11 : i64} {
  func.func @_pooler_fc_kernel(%arg0: i32, %arg1: memref<2x312xf32, #tpu.memory_space<vmem>>, %arg2: memref<312x312xbf16, #tpu.memory_space<vmem>>, %arg3: memref<1x312xf32, #tpu.memory_space<vmem>>, %arg4: memref<312x128xbf16, #tpu.memory_space<vmem>>, %arg5: memref<1x128xf32, #tpu.memory_space<vmem>>, %arg6: memref<2x128xf32, #tpu.memory_space<vmem>>) attributes {dimension_semantics = [#tpu.dimension_semantics<arbitrary>], iteration_bounds = array<i64: 1>, scalar_prefetch = 0 : i64, scratch_operands = 0 : i64, tpu.core_type = #tpu.core_type<tc>, window_params = [{pipeline_mode = #tpu.pipeline_mode<synchronous>, transform_indices = @transform_0, window_bounds = array<i64: 2, 312>}, {pipeline_mode = #tpu.pipeline_mode<synchronous>, transform_indices = @transform_1, window_bounds = array<i64: 312, 312>}, {pipeline_mode = #tpu.pipeline_mode<synchronous>, transform_indices = @transform_2, window_bounds = array<i64: 1, 312>}, {pipeline_mode = #tpu.pipeline_mode<synchronous>, transform_indices = @transform_3, window_bounds = array<i64: 312, 128>}, {pipeline_mode = #tpu.pipeline_mode<synchronous>, transform_indices = @transform_4, window_bounds = array<i64: 1, 128>}, {pipeline_mode = #tpu.pipeline_mode<synchronous>, transform_indices = @transform_5, window_bounds = array<i64: 2, 128>}]} {
    %c0 = arith.constant 0 : index
    %c0_0 = arith.constant 0 : index
    %0 = vector.load %arg1[%c0, %c0_0] : memref<2x312xf32, #tpu.memory_space<vmem>>, vector<2x312xf32>
    %1 = arith.truncf %0 : vector<2x312xf32> to vector<2x312xbf16>
    %c0_1 = arith.constant 0 : index
    %c0_2 = arith.constant 0 : index
    %2 = vector.load %arg2[%c0_1, %c0_2] : memref<312x312xbf16, #tpu.memory_space<vmem>>, vector<312x312xbf16>
    %cst = arith.constant dense<0.000000e+00> : vector<2x312xf32>
    %3 = tpu.matmul %1, %2, %cst {dimension_numbers = #tpu.dot_dimension_numbers<[1], [0], [0], [1], [0, 0, 1, 1], [], []>} : vector<2x312xbf16>, vector<312x312xbf16>, vector<2x312xf32> -> vector<2x312xf32>
    %c0_3 = arith.constant 0 : index
    %c0_4 = arith.constant 0 : index
    %4 = vector.load %arg3[%c0_3, %c0_4] : memref<1x312xf32, #tpu.memory_space<vmem>>, vector<1x312xf32>
    %5 = vector.broadcast %4 : vector<1x312xf32> to vector<2x312xf32>
    %6 = arith.addf %3, %5 : vector<2x312xf32>
    %7 = math.tanh %6 : vector<2x312xf32>
    %8 = arith.truncf %7 : vector<2x312xf32> to vector<2x312xbf16>
    %c0_5 = arith.constant 0 : index
    %c0_6 = arith.constant 0 : index
    %9 = vector.load %arg4[%c0_5, %c0_6] : memref<312x128xbf16, #tpu.memory_space<vmem>>, vector<312x128xbf16>
    %cst_7 = arith.constant dense<0.000000e+00> : vector<2x128xf32>
    %10 = tpu.matmul %8, %9, %cst_7 {dimension_numbers = #tpu.dot_dimension_numbers<[1], [0], [0], [1], [0, 0, 1, 1], [], []>} : vector<2x312xbf16>, vector<312x128xbf16>, vector<2x128xf32> -> vector<2x128xf32>
    %c0_8 = arith.constant 0 : index
    %c0_9 = arith.constant 0 : index
    %11 = vector.load %arg5[%c0_8, %c0_9] : memref<1x128xf32, #tpu.memory_space<vmem>>, vector<1x128xf32>
    %12 = vector.broadcast %11 : vector<1x128xf32> to vector<2x128xf32>
    %13 = arith.addf %10, %12 : vector<2x128xf32>
    %c0_10 = arith.constant 0 : index
    %c0_11 = arith.constant 0 : index
    %14 = vector.load %arg6[%c0_10, %c0_11] : memref<2x128xf32, #tpu.memory_space<vmem>>, vector<2x128xf32>
    tpu.vector_store %arg6[%c0_10, %c0_11], %13 {strides = array<i32>} : memref<2x128xf32, #tpu.memory_space<vmem>>, vector<2x128xf32>,
    return
  }
  func.func @transform_0(%arg0: i32) -> (i32, i32) {
    %c0_i32 = arith.constant 0 : i32
    %c0_i32_0 = arith.constant 0 : i32
    %c0_i32_1 = arith.constant 0 : i32
    return %c0_i32, %c0_i32_0 : i32, i32
  }
  func.func @transform_1(%arg0: i32) -> (i32, i32) {
    %c0_i32 = arith.constant 0 : i32
    %c0_i32_0 = arith.constant 0 : i32
    %c0_i32_1 = arith.constant 0 : i32
    return %c0_i32, %c0_i32_0 : i32, i32
  }
  func.func @transform_2(%arg0: i32) -> (i32, i32) {
    %c0_i32 = arith.constant 0 : i32
    %c0_i32_0 = arith.constant 0 : i32
    %c0_i32_1 = arith.constant 0 : i32
    return %c0_i32, %c0_i32_0 : i32, i32
  }
  func.func @transform_3(%arg0: i32) -> (i32, i32) {
    %c0_i32 = arith.constant 0 : i32
    %c0_i32_0 = arith.constant 0 : i32
    %c0_i32_1 = arith.constant 0 : i32
    return %c0_i32, %c0_i32_0 : i32, i32
  }
  func.func @transform_4(%arg0: i32) -> (i32, i32) {
    %c0_i32 = arith.constant 0 : i32
    %c0_i32_0 = arith.constant 0 : i32
    %c0_i32_1 = arith.constant 0 : i32
    return %c0_i32, %c0_i32_0 : i32, i32
  }
  func.func @transform_5(%arg0: i32) -> (i32, i32) {
    %c0_i32 = arith.constant 0 : i32
    %c0_i32_0 = arith.constant 0 : i32
    %c0_i32_1 = arith.constant 0 : i32
    return %c0_i32, %c0_i32_0 : i32, i32
  }
}

</mosaic_0001>

<bundles_post_ra>
// kernel: tpu_custom_call.1
= control target key start
LH: loop header
LB: loop body
LE: loop exit
PB: predicated region body
PF: predicated region fallthrough
CT: control target
= control target key end

     0   :  { %10 = vsyncpa [#allocation3], 0  ;;  %s1442_s0 = inlined_call_operand.hbm [shape: f32[2,312], index: 0, kind: input, shape index: {}]   ;;  %s1443_s1 = inlined_call_operand.hbm [shape: bf16[312,312], index: 1, kind: input, shape index: {}]   ;;  %s1444_s2 = inlined_call_operand.vmem [shape: f32[1,312], index: 2, kind: input, shape index: {}]   ;;  %s1445_s3 = inlined_call_operand.hbm [shape: bf16[312,128], index: 3, kind: input, shape index: {}]   ;;  %s1446_s4 = inlined_call_operand.vmem [shape: f32[1,128], index: 4, kind: input, shape index: {}]   ;;  %s1447_s5 = inlined_call_operand.hbm [shape: f32[2,128], index: 5, kind: output, shape index: {}]  }
   0x1   :  { %11 = vsyncpa [#allocation6], 0 }
   0x2   :  { %12 = vsyncpa [#allocation4], 0  ;;  %s1321_s18 = smov [#allocation5]   ;;  %s1227_s22 = scalar_lea.hbm %s1443_s1, 7488 }
   0x3   :  { %s28_s19 = sshll.u32 %s1321_s18, 4  ;;  %p1228_p0 = scmp.ne.s32.totalorder %s1443_s1, %s1227_s22  ;;  %s29_s19 = int_to_ptr.vmem [resolvable:$true] %s28_s19 }
   0x4   :  { %p1231_p1 = scmp.lt.u32.totalorder %s1227_s22, %s1443_s1 }
   0x6   :  { %p1233_p2 = pnand %p1231_p1, %p1228_p0 }
   0x8   :  { %1236 = shalt.err (!%p1233_p2)
}
   0x9   :  { %s1237_s27 = scalar_lea.vmem %s29_s19, 7488  ;;  %p1242_p4 = scmp.lt.s32.totalorder %s29_s19, %s29_s19 }
   0xa   :  { %p1238_p3 = scmp.ne.s32.totalorder %s29_s19, %s1237_s27  ;;  %p1243_p5 = scmp.lt.s32.totalorder %s1237_s27, %s1237_s27 }
   0xc   :  { %p1244_p6 = por %p1243_p5, %p1242_p4 }
   0xe   :  { %p1245_p7 = pnand %p1244_p6, %p1238_p3 }
  0x10   :  { %1248 = shalt.err (!%p1245_p7)
}
  0x11   :  { %s1322_s28 = smov 192   ;;  %s1323_s29 = smov 12  }
  0x12   :  { %34 = dma.hbm_to_vmem [thread:$0]  %s1443_s1, 7488, %s29_s19, [#allocation6], %s1322_s28, %s1322_s28, %s1323_s29  }
  0x13   :  { %s1324_s7 = smov [#allocation2]   ;;  %s1325_s9 = smov [#allocation7]  }
  0x14   :  { %s19_s8 = sshll.u32 %s1324_s7, 4  ;;  %s42_s10 = sshll.u32 %s1325_s9, 4  ;;  %s20_s8 = int_to_ptr.vmem [resolvable:$true] %s19_s8  ;;  %s43_s10 = int_to_ptr.vmem [resolvable:$true] %s42_s10 }
  0x15   :  { %s1249_s13 = scalar_lea.hbm %s1442_s0, 96 }
  0x16   :  { %p1250_p8 = scmp.ne.s32.totalorder %s1442_s0, %s1249_s13  ;;  %p1253_p9 = scmp.lt.u32.totalorder %s1249_s13, %s1442_s0 }
  0x18   :  { %p1255_p10 = pnand %p1253_p9, %p1250_p8 }
  0x1a   :  { %1258 = shalt.err (!%p1255_p10)
}
  0x1b   :  { %s1259_s1 = scalar_lea.vmem %s20_s8, 96  ;;  %p1264_p12 = scmp.lt.s32.totalorder %s20_s8, %s20_s8 }
  0x1c   :  { %p1260_p11 = scmp.ne.s32.totalorder %s20_s8, %s1259_s1  ;;  %p1265_p13 = scmp.lt.s32.totalorder %s1259_s1, %s1259_s1 }
  0x1e   :  { %p1266_p0 = por %p1265_p13, %p1264_p12 }
  0x20   :  { %p1267_p1 = pnand %p1266_p0, %p1260_p11 }
  0x22   :  { %1270 = shalt.err (!%p1267_p1)
}
  0x23   :  { %22 = dma.hbm_to_vmem [thread:$0]  %s1442_s0, 96, %s20_s8, [#allocation3]  }
  0x24   :  { %s1271_s22 = scalar_lea.hbm %s1445_s3, 2496 }
  0x25   :  { %p1272_p2 = scmp.ne.s32.totalorder %s1445_s3, %s1271_s22  ;;  %p1275_p3 = scmp.lt.u32.totalorder %s1271_s22, %s1445_s3 }
  0x27   :  { %p1277_p4 = pnand %p1275_p3, %p1272_p2 }
  0x29   :  { %1280 = shalt.err (!%p1277_p4)
}
  0x2a   :  { %s1281_s27 = scalar_lea.vmem %s43_s10, 2496  ;;  %p1286_p6 = scmp.lt.s32.totalorder %s43_s10, %s43_s10 }
  0x2b   :  { %p1282_p5 = scmp.ne.s32.totalorder %s43_s10, %s1281_s27  ;;  %p1287_p7 = scmp.lt.s32.totalorder %s1281_s27, %s1281_s27 }
  0x2d   :  { %p1288_p8 = por %p1287_p7, %p1286_p6 }
  0x2f   :  { %p1289_p9 = pnand %p1288_p8, %p1282_p5 }
  0x31   :  { %1292 = shalt.err (!%p1289_p9)
}
  0x32   :  { %s1326_s0 = smov 64   ;;  %s1327_s28 = smov 4  }
  0x33   :  { %48 = dma.hbm_to_vmem [thread:$0]  %s1445_s3, 2496, %s43_s10, [#allocation6], %s1326_s0, %s1326_s0, %s1327_s28  }
  0x34   :  { %1315 = dma.done.wait [#allocation3], 96  }
  0x35   :  { %1316 = vsyncadd [#allocation3], 4294967200 }
  0x36   :  { %1317 = dma.done.wait [#allocation6], 9984  }
  0x37   :  { %1318 = vsyncadd [#allocation6], 4294957312  ;;  %v1121_v0 = vld [vmem:[#allocation5 + $0x4] ss:$12 sps:$4 sm:$0xff]   ;;  %v1123_v1 = vld [vmem:[#allocation5] ss:$12 sps:$4 sm:$0xff]   ;;  %v67_v24 = vlaneseq }
  0x38   :  { %506 = vmatprep.subr.bf16.mxu0 %v1121_v0  ;;  %v1124_v2 = vld [vmem:[#allocation5 + $0x1c] ss:$12 sps:$4 sm:$0xff]   ;;  %v1126_v3 = vld [vmem:[#allocation5 + $0x18] ss:$12 sps:$4 sm:$0xff]   ;;  %v1127_v4 = vld [vmem:[#allocation5 + $0x34] ss:$12 sps:$4 sm:$0xff]  }
  0x39   :  { %507 = vmatpush1.bf16.msra.mxu0 %v1123_v1  ;;  %v1129_v5 = vld [vmem:[#allocation5 + $0x30] ss:$12 sps:$4 sm:$0xff]   ;;  %v1130_v6 = vld [vmem:[#allocation5 + $0x4c] ss:$12 sps:$4 sm:$0xff]   ;;  %v1132_v7 = vld [vmem:[#allocation5 + $0x48] ss:$12 sps:$4 sm:$0xff]  }
  0x3a   :  { %508 = vmatprep.subr.bf16.mxu0 %v1124_v2  ;;  %v1142_v8 = vld [vmem:[#allocation5 + $0xc8] ss:$12 sps:$4 sm:$0xff]   ;;  %v1133_v10 = vld [vmem:[#allocation5 + $0x64] ss:$12 sps:$4 sm:$0xff]   ;;  %v1147_v11 = vld [vmem:[#allocation5 + $0xe0] ss:$12 sps:$4 sm:$0xff]  }
  0x3b   :  { %v1143_v9 = vld [vmem:[#allocation5 + $0x8] ss:$12 sps:$4 sm:$0xff]   ;;  %1025 = vmatprep.subr.bf16.mxu1 %v1142_v8  ;;  %v1148_v12 = vld [vmem:[#allocation5 + $0x20] ss:$12 sps:$4 sm:$0xff]   ;;  %v1152_v15 = vld [vmem:[#allocation5 + $0xf8] ss:$12 sps:$4 sm:$0xff]  }
  0x3c   :  { %1026 = vmatpush3.bf16.msra.mxu1 %v1143_v9  ;;  %v1135_v13 = vld [vmem:[#allocation5 + $0x60] ss:$12 sps:$4 sm:$0xff]   ;;  %v1136_v14 = vld [vmem:[#allocation5 + $0x7c] ss:$12 sps:$4 sm:$0xff]   ;;  %v1153_v16 = vld [vmem:[#allocation5 + $0x38] ss:$12 sps:$4 sm:$0xff]  }
  0x3d   :  { %509 = vmatpush1.bf16.msra.mxu0 %v1126_v3  ;;  %1027 = vmatprep.subr.bf16.mxu1 %v1147_v11  ;;  %v1138_v17 = vld [vmem:[#allocation5 + $0x78] ss:$12 sps:$4 sm:$0xff]   ;;  %v1139_v18 = vld [vmem:[#allocation5 + $0x94] ss:$12 sps:$4 sm:$0xff]   ;;  %v1157_v19 = vld [vmem:[#allocation5 + $0x110] ss:$12 sps:$4 sm:$0xff]  }
  0x3e   :  { %510 = vmatprep.subr.bf16.mxu0 %v1127_v4  ;;  %v1158_v20 = vld [vmem:[#allocation5 + $0x50] ss:$12 sps:$4 sm:$0xff]   ;;  %v1162_v22 = vld [vmem:[#allocation5 + $0x128] ss:$12 sps:$4 sm:$0xff]   ;;  %v1144_v23 = vld [vmem:[#allocation5 + $0xac] ss:$12 sps:$4 sm:$0xff]  }
  0x3f   :  { %v1141_v21 = vld [vmem:[#allocation5 + $0x90] ss:$12 sps:$4 sm:$0xff]   ;;  %v1163_v25 = vld [vmem:[#allocation5 + $0x68] ss:$12 sps:$4 sm:$0xff]   ;;  %v1328_v26 = vmov 1983009808  }
  0x40   :  { %1028 = vmatpush3.bf16.msra.mxu1 %v1148_v12  ;;  %v65_v27 = vunpack.c.l.s4 %v1328_v26  ;;  %v1167_v28 = vld [vmem:[#allocation5 + $0x140] ss:$12 sps:$4 sm:$0xff]   ;;  %v1146_v29 = vld [vmem:[#allocation5 + $0xa8] ss:$12 sps:$4 sm:$0xff]   ;;  %v1149_v30 = vld [vmem:[#allocation5 + $0xc4] ss:$12 sps:$4 sm:$0xff]  }
  0x41   :  { %511 = vmatpush1.bf16.msra.mxu0 %v1129_v5  ;;  %1029 = vmatprep.subr.bf16.mxu1 %v1152_v15  ;;  %v1399_v31 = vshrl.u32 %v67_v24, 7  ;;  %v1168_v32 = vld [vmem:[#allocation5 + $0x80] ss:$12 sps:$4 sm:$0xff]   ;;  %v1172_v34 = vld [vmem:[#allocation5 + $0x158] ss:$12 sps:$4 sm:$0xff]   ;;  %v1329_v51 = vmov 0.0  }
  0x42   :  { %512 = vmatprep.subr.bf16.mxu0 %v1130_v6  ;;  %v66_v33 = vunpack.c.0.s8 %v65_v27  ;;  %v1151_v35 = vld [vmem:[#allocation5 + $0xc0] ss:$12 sps:$4 sm:$0xff]   ;;  %v1154_v36 = vld [vmem:[#allocation5 + $0xdc] ss:$12 sps:$4 sm:$0xff]   ;;  %v1173_v37 = vld [vmem:[#allocation5 + $0x98] ss:$12 sps:$4 sm:$0xff]  }
  0x43   :  { %v1177_v39 = vld [vmem:[#allocation5 + $0x170] ss:$12 sps:$4 sm:$0xff]   ;;  %v1156_v40 = vld [vmem:[#allocation5 + $0xd8] ss:$12 sps:$4 sm:$0xff]   ;;  %v1159_v41 = vld [vmem:[#allocation5 + $0xf4] ss:$12 sps:$4 sm:$0xff]  }
  0x44   :  { %1030 = vmatpush3.bf16.msra.mxu1 %v1153_v16  ;;  %v69_v38 = vsub.s32 %v66_v33, %v1399_v31  ;;  %v61_v42 = vld [vmem:[#allocation2] sm:$0x3f]  ;;  %v1183_v50 = vld [vmem:[#allocation5 + $0x188] ss:$12 sps:$4 sm:$0xff]   ;;  %v1169_v53 = vld [vmem:[#allocation5 + $0x124] ss:$12 sps:$4 sm:$0xff]  }
  0x45   :  { %513 = vmatpush1.bf16.msra.mxu0 %v1132_v7  ;;  %1031 = vmatprep.subr.bf16.mxu1 %v1157_v19  ;;  %v1178_v43 = vld [vmem:[#allocation5 + $0xb0] ss:$12 sps:$4 sm:$0xff]   ;;  %v1164_v47 = vld [vmem:[#allocation5 + $0x10c] ss:$12 sps:$4 sm:$0xff]   ;;  %v1166_v52 = vld [vmem:[#allocation5 + $0x108] ss:$12 sps:$4 sm:$0xff]   ;;  %v63_v59 = vcombine.high %v61_v42, %v61_v42 }
  0x46   :  { %514 = vmatprep.subr.bf16.mxu0 %v1133_v10  ;;  %v70_v44 = vrot.slane %v61_v42, %v69_v38  ;;  %v1161_v45 = vld [vmem:[#allocation5 + $0xf0] ss:$12 sps:$4 sm:$0xff]   ;;  %vm496_vm0 = vcmask 1043456   ;;  %v1171_v55 = vld [vmem:[#allocation5 + $0x120] ss:$12 sps:$4 sm:$0xff]   ;;  %vm1330_vm1 = vmmov 0  }
  0x47   :  { %v1195_v54 = vld [vmem:[#allocation5 + $0x1d0] ss:$0 sps:$4 sm:$0xff]   ;;  %v1187_v56 = vld [vmem:[#allocation5 + $0x1a0] ss:$12 sps:$4 sm:$0xff]   ;;  %v1174_v57 = vld [vmem:[#allocation5 + $0x13c] ss:$12 sps:$4 sm:$0xff]   ;;  %v77_v63 = vrot.slane %v63_v59, %v69_v38 }
  0x48   :  { %1032 = vmatpush3.bf16.msra.mxu1 %v1158_v20  ;;  %v78_v46 = vcombine.high %v70_v44, %v70_v44  ;;  %v82_v48 = vpack.c.bf16 %v70_v44, %v70_v44  ;;  %v1191_v58 = vld [vmem:[#allocation5 + $0x1b8] ss:$12 sps:$4 sm:$0xff]   ;;  %v504_v60 = vsel %vm496_vm0, %v1195_v54, 0  ;;  %vm492_vm2 = vcmask 457728   ;;  %v1179_v62 = vld [vmem:[#allocation5 + $0x154] ss:$12 sps:$4 sm:$0xff]  }
  0x49   :  { %515 = vmatpush1.bf16.msra.mxu0 %v1135_v13  ;;  %1033 = vmatprep.subr.bf16.mxu1 %v1162_v22  ;;  %v1176_v61 = vld [vmem:[#allocation5 + $0x138] ss:$12 sps:$4 sm:$0xff]   ;;  %v1181_v1 = vld [vmem:[#allocation5 + $0x150] ss:$12 sps:$4 sm:$0xff]   ;;  %v84_v4 = vpack.c.bf16 %v77_v63, %v77_v63  ;;  %v1186_v5 = vld [vmem:[#allocation5 + $0x168] ss:$12 sps:$4 sm:$0xff]  }
  0x4a   :  { %516 = vmatprep.subr.bf16.mxu0 %v1136_v14  ;;  %v83_v49 = vpack.c.bf16 %v78_v46, %v78_v46  ;;  %v1201_v0 = vld [vmem:[#allocation7 + $0x40] sm:$0xff]   ;;  %v1190_v6 = vld [vmem:[#allocation5 + $0x184] ss:$12 sps:$4 sm:$0xff]   ;;  %v1188_v7 = vld [vmem:[#allocation5 + $0x180] ss:$12 sps:$4 sm:$0xff]   ;;  %v1331_v10 = vmov 0  }
  0x4b   :  { %v1184_v2 = vld [vmem:[#allocation5 + $0x16c] ss:$12 sps:$4 sm:$0xff]   ;;  %v1194_v8 = vld [vmem:[#allocation5 + $0x19c] ss:$12 sps:$4 sm:$0xff]   ;;  %v1198_v11 = vld [vmem:[#allocation5 + $0x1b4] ss:$12 sps:$4 sm:$0xff]  }
  0x4c   :  { %1034 = vmatpush3.bf16.msra.mxu1 %v1163_v25  ;;  %620 = vmatprep.mubr.bf16.mxu1 %v83_v49  ;;  %v1202_v3 = vld [vmem:[#allocation7] sm:$0xff]   ;;  %v161_v12 = vld [vmem:[#allocation5 + $0x1c8] sm:$0xff]  ;;  %v1196_v13 = vld [vmem:[#allocation5 + $0x1b0] ss:$12 sps:$4 sm:$0xff]   ;;  %v175_v42 = vsub.s32 2, %v1399_v31  ;;  %v171_v54 = vsub.s32 1, %v1399_v31 }
  0x4d   :  { %517 = vmatpush1.bf16.msra.mxu0 %v1138_v17  ;;  %1035 = vmatprep.subr.bf16.mxu1 %v1167_v28  ;;  %v1192_v9 = vld [vmem:[#allocation5 + $0x198] ss:$12 sps:$4 sm:$0xff]   ;;  %v998_v14 = vcombine.high %v161_v12, %v161_v12  ;;  %v997_v15 = vcombine.low %v161_v12, %v161_v12  ;;  %v1203_v17 = vld [vmem:[#allocation7 + $0x48] sm:$0xff]   ;;  %v1208_v22 = vld [vmem:[#allocation7 + $0x58] sm:$0xff]   ;;  %s1332_s8 = smov [#allocation8]  }
  0x4e   :  { %518 = vmatprep.subr.bf16.mxu0 %v1139_v18  ;;  %538 = vmatprep.mubr.bf16.mxu0 %v83_v49  ;;  %v1204_v18 = vld [vmem:[#allocation7 + $0x8] sm:$0xff]   ;;  %v1205_v19 = vld [vmem:[#allocation7 + $0x50] sm:$0xff]   ;;  %v1206_v20 = vld [vmem:[#allocation7 + $0x80] sm:$0xff]   ;;  %s930_s9 = sshll.u32 %s1332_s8, 4  ;;  %s931_s9 = int_to_ptr.vmem [resolvable:$true] %s930_s9 }
  0x4f   :  { %v498_v16 = vsel %vm496_vm0, %v997_v15, 0  ;;  %v1210_v24 = vld [vmem:[#allocation7 + $0x18] sm:$0xff]   ;;  %v1211_v25 = vld [vmem:[#allocation7 + $0x60] sm:$0xff]   ;;  %v1212_v26 = vld [vmem:[#allocation7 + $0x90] sm:$0xff]   ;;  %s1293_s10 = scalar_lea.vmem %s931_s9, 32  ;;  %p1298_p11 = scmp.lt.s32.totalorder %s931_s9, %s931_s9 }
  0x50   :  { %1036 = vmatpush3.bf16.msra.mxu1 %v1168_v32  ;;  %v1213_v27 = vld [vmem:[#allocation7 + $0x20] sm:$0xff]   ;;  %v1215_v28 = vld [vmem:[#allocation7 + $0x98] ss:$0 sps:$4 sm:$0xff]   ;;  %v1216_v32 = vld [vmem:[#allocation7 + $0x28] sm:$0xff]   ;;  %p1294_p10 = scmp.ne.s32.totalorder %s931_s9, %s1293_s10  ;;  %p1299_p12 = scmp.lt.s32.totalorder %s1293_s10, %s1293_s10 }
  0x51   :  { %519 = vmatpush1.bf16.msra.mxu0 %v1141_v21  ;;  %1037 = vmatprep.subr.bf16.mxu1 %v1172_v34  ;;  %v1207_v21 = vld [vmem:[#allocation7 + $0x10] sm:$0xff]  }
  0x52   :  { %520 = vmatprep.subr.bf16.mxu0 %v1144_v23  ;;  %v1209_v23 = vld [vmem:[#allocation7 + $0x88] sm:$0xff]   ;;  %v1217_v33 = vld [vmem:[#allocation7 + $0x70] sm:$0xff]   ;;  %p1300_p13 = por %p1299_p12, %p1298_p11 }
  0x53   :  { %v1218_v34 = vld [vmem:[#allocation7 + $0x30] sm:$0xff]  }
  0x54   :  { %1038 = vmatpush3.bf16.msra.mxu1 %v1173_v37  ;;  %p1301_p0 = pnand %p1300_p13, %p1294_p10 }
  0x55   :  { %521 = vmatpush1.bf16.msra.mxu0 %v1146_v29  ;;  %1039 = vmatprep.subr.bf16.mxu1 %v1177_v39  ;;  %v1214_v29 = vld [vmem:[#allocation7 + $0x68] sm:$0xff]  }
  0x56   :  { %522 = vmatprep.subr.bf16.mxu0 %v1149_v30  ;;  %v841_v30 = vsel %vm496_vm0, %v1215_v28, 0 }
  0x58   :  { %1040 = vmatpush3.bf16.msra.mxu1 %v1178_v43  ;;  %v163_v43 = vld [vmem:[%s1444_s2] sm:$0x7] }
  0x59   :  { %523 = vmatpush1.bf16.msra.mxu0 %v1151_v35  ;;  %1079 = vmatprep.subr.bf16.mxu1 %v1329_v51  ;;  %v1219_v35 = vld [vmem:[#allocation7 + $0x78] sm:$0xff]   ;;  %v176_v44 = vrot.slane %v163_v43, %v175_v42 }
  0x5a   :  { %524 = vmatprep.subr.bf16.mxu0 %v1154_v36  ;;  %v1220_v36 = vld [vmem:[#allocation7 + $0x38] sm:$0xff]  }
  0x5b   :  { %621 = vmatmul.mubr.bf16.vlgmr.msra.gmra.mrb[0].mxu1 %v82_v48 }
  0x5c   :  { %1080 = vmatpush3.bf16.msra.mxu1 %v1183_v50  ;;  %1087 = vmatprep.mubr.msk.bf16.mxu1 %vm1330_vm1, %v1329_v51 }
  0x5d   :  { %525 = vmatpush1.bf16.msra.mxu0 %v1156_v40  ;;  %1081 = vmatprep.subr.bf16.mxu1 %v1329_v51 }
  0x5e   :  { %526 = vmatprep.subr.bf16.mxu0 %v1159_v41 }
  0x60   :  { %1082 = vmatpush3.bf16.msra.mxu1 %v1187_v56  ;;  %v172_v56 = vrot.slane %v163_v43, %v171_v54 }
  0x61   :  { %527 = vmatpush1.bf16.msra.mxu0 %v1161_v45  ;;  %1083 = vmatprep.subr.bf16.mxu1 %v1329_v51 }
  0x62   :  { %528 = vmatprep.subr.bf16.mxu0 %v1164_v47 }
  0x64   :  { %1084 = vmatpush3.bf16.msra.mxu1 %v1191_v58 }
  0x65   :  { %529 = vmatpush1.bf16.msra.mxu0 %v1166_v52  ;;  %1085 = vmatprep.subr.bf16.mxu1 %v1329_v51 }
  0x66   :  { %530 = vmatprep.subr.bf16.mxu0 %v1169_v53  ;;  %v167_v53 = vsub.s32 0, %v1399_v31 }
  0x68   :  { %1086 = vmatpush3.bf16.msra.mxu1 %v504_v60 }
  0x69   :  { %531 = vmatpush1.bf16.msra.mxu0 %v1171_v55  ;;  %1052 = vmatprep.subr.bf16.mxu1 %v1201_v0  ;;  %v168_v55 = vrot.slane %v163_v43, %v167_v53 }
  0x6a   :  { %532 = vmatprep.subr.bf16.mxu0 %v1174_v57 }
  0x6b   :  { %1088 = vmatmul.mubr.msk.bf16.vlgmr.msra.gmra.mrb[4].mxu1 %vm492_vm2, %v84_v4 }
  0x6c   :  { %1053 = vmatpush3.bf16.msra.mxu1 %v1202_v3 }
  0x6d   :  { %533 = vmatpush1.bf16.msra.mxu0 %v1176_v61  ;;  %1054 = vmatprep.subr.bf16.mxu1 %v1203_v17 }
  0x6e   :  { %534 = vmatprep.subr.bf16.mxu0 %v1179_v62 }
  0x70   :  { %1055 = vmatpush3.bf16.msra.mxu1 %v1204_v18 }
  0x71   :  { %535 = vmatpush1.bf16.msra.mxu0 %v1181_v1  ;;  %1056 = vmatprep.subr.bf16.mxu1 %v1205_v19 }
  0x72   :  { %536 = vmatprep.subr.bf16.mxu0 %v1184_v2 }
  0x74   :  { %1057 = vmatpush3.bf16.msra.mxu1 %v1207_v21 }
  0x75   :  { %537 = vmatpush1.bf16.msra.mxu0 %v1186_v5  ;;  %1058 = vmatprep.subr.bf16.mxu1 %v1208_v22 }
  0x76   :  { %547 = vmatprep.subr.bf16.mxu0 %v1190_v6 }
  0x78   :  { %539 = vmatmul.mubr.bf16.vlgmr.msra.gmra.mrb[0].mxu0 %v82_v48  ;;  %1059 = vmatpush3.bf16.msra.mxu1 %v1210_v24 }
  0x79   :  { %548 = vmatpush1.bf16.msra.mxu0 %v1188_v7  ;;  %579 = vmatprep.mubr.bf16.mxu0 %v1331_v10  ;;  %v1003_v7 = vld [vmem:[%s1446_s4] ss:$0 sm:$0xff] }
  0x7a   :  { %549 = vmatprep.subr.bf16.mxu0 %v1194_v8  ;;  %1060 = vmatprep.subr.bf16.mxu1 %v1211_v25 }
  0x7c   :  { %1061 = vmatpush3.bf16.msra.mxu1 %v1213_v27 }
  0x7d   :  { %550 = vmatpush1.bf16.msra.mxu0 %v1192_v9  ;;  %1062 = vmatprep.subr.bf16.mxu1 %v1214_v29 }
  0x7e   :  { %551 = vmatprep.subr.bf16.mxu0 %v1198_v11 }
  0x80   :  { %1063 = vmatpush3.bf16.msra.mxu1 %v1216_v32 }
  0x81   :  { %552 = vmatpush1.bf16.msra.mxu0 %v1196_v13  ;;  %1064 = vmatprep.subr.bf16.mxu1 %v1217_v33 }
  0x82   :  { %1000 = vmatprep.subr.msk.bf16.mxu0 %vm496_vm0, %v998_v14 }
  0x84   :  { %1065 = vmatpush3.bf16.msra.mxu1 %v1218_v34 }
  0x85   :  { %554 = vmatpush1.bf16.msra.mxu0 %v498_v16  ;;  %1066 = vmatprep.subr.bf16.mxu1 %v1219_v35 }
  0x86   :  { %1091 = vmatprep.subr.bf16.mxu0 %v1329_v51 }
  0x88   :  { %1001 = vmatmul.mubr.msk.bf16.vlgmr.msra.gmra.mrb[0].mxu0 %vm492_vm2, %v84_v4  ;;  %1067 = vmatpush3.bf16.msra.mxu1 %v1220_v36 }
  0x89   :  { %1099 = vmatprep.mubr.msk.bf16.mxu0 %vm1330_vm1, %v1329_v51  ;;  %1092 = vmatpush3.bf16.msra.mxu0 %v1206_v20 }
  0x8a   :  { %1093 = vmatprep.subr.bf16.mxu0 %v1329_v51 }
  0x8d   :  { %1094 = vmatpush3.bf16.msra.mxu0 %v1209_v23 }
  0x8e   :  { %1095 = vmatprep.subr.bf16.mxu0 %v1329_v51 }
  0x91   :  { %1096 = vmatpush3.bf16.msra.mxu0 %v1212_v26 }
  0x92   :  { %1097 = vmatprep.subr.bf16.mxu0 %v1329_v51 }
  0x95   :  { %1098 = vmatpush3.bf16.msra.mxu0 %v841_v30 }
 0x12e   :  { %v1041_v37 = vpop.f32.mrb[0].mxu1 }
 0x12f   :  { %v1042_v38 = vpop.f32.mrb[1].mxu1 }
 0x130   :  { %v1043_v39 = vadd.f32 %v1042_v38, %v1041_v37  ;;  %v1044_v40 = vpop.f32.mrb[2].mxu1 }
 0x131   :  { %v1045_v41 = vpop.f32.mrb[3].mxu1 }
 0x132   :  { %v623_v45 = vadd.f32 %v1043_v39, %v176_v44 }
 0x13e   :  { %v662_v46 = vpop.f32.mrb[4].mxu1 }
 0x13f   :  { %v663_v47 = vadd.f32 %v662_v46, %v623_v45  ;;  %v1089_v48 = vpop.f32.mrb[5].mxu1 }
 0x140   :  { %v665_v49 = vpop.f32.mrb[6].mxu1 }
 0x141   :  { %1221 = vtanh.f32 %v663_v47  ;;  %v1090_v50 = vpop.f32.mrb[7].mxu1 }
 0x14b   :  { %v1222_v51 = vpop.eup %1221 }
 0x14c   :  { %v673_v52 = vpack.c.bf16 %v1222_v51, %v1222_v51 }
 0x14e   :  { %1100 = vmatmul.mubr.msk.bf16.vlgmr.msra.gmra.mrb[4].mxu0 %vm492_vm2, %v673_v52 }
 0x15b   :  { %v581_v57 = vpop.f32.mrb[0].mxu0 }
 0x15c   :  { %v1103_v58 = vadd.f32 %v581_v57, %v168_v55  ;;  %v583_v59 = vpop.f32.mrb[1].mxu0 }
 0x15d   :  { %v1104_v60 = vadd.f32 %v583_v59, %v172_v56  ;;  %v585_v61 = vpop.f32.mrb[2].mxu0 }
 0x15e   :  { %1223 = vtanh.f32 %v1103_v58  ;;  %v586_v62 = vpop.f32.mrb[3].mxu0 }
 0x15f   :  { %1225 = vtanh.f32 %v1104_v60 }
 0x168   :  { %v1224_v63 = vpop.eup %1223 }
 0x169   :  { %v1226_v0 = vpop.eup %1225  ;;  %v671_v2 = vpack.c.bf16 %v1224_v63, %v1224_v63 }
 0x16a   :  { %v672_v1 = vpack.c.bf16 %v1226_v0, %v1226_v0 }
 0x16c   :  { %875 = vmatprep.mubr.bf16.mxu1 %v672_v1 }
 0x16d   :  { %876 = vmatmul.mubr.bf16.vlgmr.msra.gmra.mrb[8].mxu1 %v671_v2 }
 0x221   :  { %v917_v3 = vpop.f32.mrb[4].mxu0 }
 0x222   :  { %v1101_v31 = vpop.f32.mrb[5].mxu0 }
 0x223   :  { %v920_v4 = vpop.f32.mrb[6].mxu0 }
 0x224   :  { %v1102_v5 = vpop.f32.mrb[7].mxu0 }
 0x240   :  { %v1068_v6 = vpop.f32.mrb[8].mxu1 }
 0x241   :  { %v1069_v8 = vpop.f32.mrb[9].mxu1 }
 0x242   :  { %v1070_v9 = vadd.f32 %v1069_v8, %v1068_v6  ;;  %v1071_v10 = vpop.f32.mrb[10].mxu1 }
 0x243   :  { %v1072_v11 = vpop.f32.mrb[11].mxu1 }
 0x244   :  { %v878_v12 = vadd.f32 %v1070_v9, %v1003_v7 }
 0x246   :  { %v918_v13 = vadd.f32 %v917_v3, %v878_v12 }
 0x248   :  { %923 = vst [vmem:[#allocation8] sm:$0x3] %v918_v13 }
 0x249   :  { %1304 = shalt.err (!%p1301_p0)
}
 0x24a   :  { %s1305_s4 = scalar_lea.hbm %s1447_s5, 32 }
 0x24b   :  { %p1306_p1 = scmp.ne.s32.totalorder %s1447_s5, %s1305_s4  ;;  %p1309_p2 = scmp.lt.u32.totalorder %s1305_s4, %s1447_s5 }
 0x24d   :  { %p1311_p3 = pnand %p1309_p2, %p1306_p1 }
 0x24f   :  { %1314 = shalt.err (!%p1311_p3)
}
 0x250   :  { %933 = dma.vmem_to_hbm [thread:$0]  %s931_s9, 32, %s1447_s5, [#allocation4]  }
 0x251   :  { %1319 = dma.done.wait [#allocation4], 32  }
 0x252   :  { %1320 = vsyncadd [#allocation4], 4294967264 }
 0x253   :  { %937 = vsyncpa [#allocation3], 1 }
 0x254   :  { %938 = vsyncpa [#allocation6], 1 }
 0x255   :  { %939 = vsyncpa [#allocation4], 1 }

</bundles_post_ra>
